<compile_context>
chip_gen: v7x
topology: tpu7x:2x2x1
jax: 0.10.0
libtpu: 0.0.40
codegen_flags: <defaults>
</compile_context>

<pallas_src>
import functools

import jax
import jax.numpy as jnp
from jax.experimental import pallas as pl
from jax.experimental.pallas import tpu as pltpu


def _head_kernel(x_ref, wk_ref, wq_ref, wv_ref, o_ref, *, scale):
    # x_ref:  (bb, T, C)   tile of bb full sequences
    # w*_ref: (C, hs)      resident projection weights (no bias)
    # o_ref:  (bb, T, hs)
    x = x_ref[...]
    wk = wk_ref[...]
    wq = wq_ref[...]
    wv = wv_ref[...]

    # q/k/v projections (batched over bb sequences), f32 MXU accumulation.
    q = jnp.einsum("btc,ch->bth", x, wq, preferred_element_type=jnp.float32)
    k = jnp.einsum("btc,ch->bth", x, wk, preferred_element_type=jnp.float32)
    v = jnp.einsum("btc,ch->bth", x, wv, preferred_element_type=jnp.float32)

    # wei = q @ k^T * C**-0.5   (scale uses n_embd, exactly as in the module)
    s = jnp.einsum("bqh,bkh->bqk", q, k, preferred_element_type=jnp.float32)
    s = s * scale

    # softmax over the key axis (the reference module has NO causal mask)
    s = s - jnp.max(s, axis=-1, keepdims=True)
    p = jnp.exp(s)
    p = p / jnp.sum(p, axis=-1, keepdims=True)

    # out = wei @ v
    o = jnp.einsum("bqk,bkh->bqh", p, v, preferred_element_type=jnp.float32)
    o_ref[...] = o.astype(o_ref.dtype)


def head_temporal(x, wk, wq, wv, *, bb=16):
    """x: (B, T, C) float32; wk/wq/wv: (C, head_size). Returns (B, T, head_size)."""
    B, T, C = x.shape
    hs = wq.shape[1]
    scale = float(C) ** -0.5

    # Batch-chunk tile; pad B up to a multiple instead of asserting.
    bb = max(1, min(bb, B))
    n_blocks = pl.cdiv(B, bb)
    Bp = n_blocks * bb
    if Bp != B:
        # Padded rows are all-zero: scores are 0 -> uniform softmax -> out 0,
        # no NaNs, and they are sliced off below.
        x = jnp.pad(x, ((0, Bp - B), (0, 0), (0, 0)))

    flops = Bp * (3 * 2 * T * C * hs + 2 * 2 * T * T * hs)
    bytes_accessed = 4 * (Bp * T * C + 3 * C * hs + Bp * T * hs)
    cost = pl.CostEstimate(
        flops=flops, transcendentals=Bp * T * T, bytes_accessed=bytes_accessed
    )

    kernel = functools.partial(_head_kernel, scale=scale)

    out = pl.pallas_call(
        kernel,
        out_shape=jax.ShapeDtypeStruct((Bp, T, hs), x.dtype),
        grid_spec=pltpu.PrefetchScalarGridSpec(
            num_scalar_prefetch=0,
            grid=(n_blocks,),
            in_specs=[
                pl.BlockSpec((bb, T, C), lambda i: (i, 0, 0)),  # x batch tile
                pl.BlockSpec((C, hs), lambda i: (0, 0)),        # Wk (resident)
                pl.BlockSpec((C, hs), lambda i: (0, 0)),        # Wq (resident)
                pl.BlockSpec((C, hs), lambda i: (0, 0)),        # Wv (resident)
            ],
            out_specs=pl.BlockSpec((bb, T, hs), lambda i: (i, 0, 0)),
        ),
        compiler_params=pltpu.CompilerParams(
            dimension_semantics=("parallel",),
        ),
        cost_estimate=cost,
    )(x, wk, wq, wv)

    return out[:B]


def _init_params(key, n_embd, head_size):
    """Deterministic init mimicking nn.Linear's U(-1/sqrt(in), 1/sqrt(in))."""
    k1, k2, k3 = jax.random.split(key, 3)
    bound = 1.0 / jnp.sqrt(jnp.float32(n_embd))
    # stored pre-transposed: (in, out); bias=False in the module
    wk = jax.random.uniform(k1, (n_embd, head_size), jnp.float32, -bound, bound)
    wq = jax.random.uniform(k2, (n_embd, head_size), jnp.float32, -bound, bound)
    wv = jax.random.uniform(k3, (n_embd, head_size), jnp.float32, -bound, bound)
    return wk, wq, wv


if __name__ == "__main__":
    key = jax.random.PRNGKey(0)
    B, T, n_embd, head_size = 2, 8, 32, 16  # small demo shapes

    kx, kp = jax.random.split(key)
    x = jax.random.normal(kx, (B, T, n_embd), jnp.float32)
    wk, wq, wv = _init_params(kp, n_embd, head_size)

    out = head_temporal(x, wk, wq, wv)
    out = jax.block_until_ready(out)

    # plain-JAX reference (float32; dropout = identity)
    q = x @ wq
    k = x @ wk
    v = x @ wv
    wei = (q @ jnp.swapaxes(k, -2, -1)) * (float(n_embd) ** -0.5)
    wei = jax.nn.softmax(wei, axis=-1)
    ref = wei @ v

    assert out.shape == (B, T, head_size)
    assert jnp.allclose(out, ref, atol=1e-5, rtol=1e-5)

    print("KERNEL_OK")
</pallas_src>

<mosaic_0001>
module attributes {stable_mosaic.version = 11 : i64} {
  func.func @_head_kernel(%arg0: i32, %arg1: memref<2x8x32xf32, #tpu.memory_space<vmem>>, %arg2: memref<32x16xf32, #tpu.memory_space<vmem>>, %arg3: memref<32x16xf32, #tpu.memory_space<vmem>>, %arg4: memref<32x16xf32, #tpu.memory_space<vmem>>, %arg5: memref<2x8x16xf32, #tpu.memory_space<vmem>>) attributes {dimension_semantics = [#tpu.dimension_semantics<parallel>], iteration_bounds = array<i64: 1>, scalar_prefetch = 0 : i64, scratch_operands = 0 : i64, tpu.core_type = #tpu.core_type<tc>, window_params = [{transform_indices = @transform_0, window_bounds = array<i64: 2, 8, 32>}, {pipeline_mode = #tpu.pipeline_mode<synchronous>, transform_indices = @transform_1, window_bounds = array<i64: 32, 16>}, {pipeline_mode = #tpu.pipeline_mode<synchronous>, transform_indices = @transform_2, window_bounds = array<i64: 32, 16>}, {pipeline_mode = #tpu.pipeline_mode<synchronous>, transform_indices = @transform_3, window_bounds = array<i64: 32, 16>}, {transform_indices = @transform_4, window_bounds = array<i64: 2, 8, 16>}]} {
    %c0 = arith.constant 0 : index
    %c0_0 = arith.constant 0 : index
    %c0_1 = arith.constant 0 : index
    %0 = vector.load %arg1[%c0, %c0_0, %c0_1] : memref<2x8x32xf32, #tpu.memory_space<vmem>>, vector<2x8x32xf32>
    %c0_2 = arith.constant 0 : index
    %c0_3 = arith.constant 0 : index
    %1 = vector.load %arg2[%c0_2, %c0_3] : memref<32x16xf32, #tpu.memory_space<vmem>>, vector<32x16xf32>
    %c0_4 = arith.constant 0 : index
    %c0_5 = arith.constant 0 : index
    %2 = vector.load %arg3[%c0_4, %c0_5] : memref<32x16xf32, #tpu.memory_space<vmem>>, vector<32x16xf32>
    %c0_6 = arith.constant 0 : index
    %c0_7 = arith.constant 0 : index
    %3 = vector.load %arg4[%c0_6, %c0_7] : memref<32x16xf32, #tpu.memory_space<vmem>>, vector<32x16xf32>
    "tpu.trace_start"() <{level = 10 : i32, message = "btc,ch->bth"}> : () -> ()
    %cst = arith.constant dense<0.000000e+00> : vector<2x8x16xf32>
    %4 = tpu.matmul %0, %2, %cst {dimension_numbers = #tpu.dot_dimension_numbers<[2], [0], [0, 1], [1], [0, 0, 0, 1, 1, 1], [], []>} : vector<2x8x32xf32>, vector<32x16xf32>, vector<2x8x16xf32> -> vector<2x8x16xf32>
    %cst_8 = arith.constant dense<0.000000e+00> : vector<2x8x16xf32>
    %5 = tpu.matmul %0, %1, %cst_8 {dimension_numbers = #tpu.dot_dimension_numbers<[2], [0], [0, 1], [1], [0, 0, 0, 1, 1, 1], [], []>} : vector<2x8x32xf32>, vector<32x16xf32>, vector<2x8x16xf32> -> vector<2x8x16xf32>
    %cst_9 = arith.constant dense<0.000000e+00> : vector<2x8x16xf32>
    %6 = tpu.matmul %0, %3, %cst_9 {dimension_numbers = #tpu.dot_dimension_numbers<[2], [0], [0, 1], [1], [0, 0, 0, 1, 1, 1], [], []>} : vector<2x8x32xf32>, vector<32x16xf32>, vector<2x8x16xf32> -> vector<2x8x16xf32>
    "tpu.trace_stop"() : () -> ()
    "tpu.trace_start"() <{level = 10 : i32, message = "bqh,bkh->bqk"}> : () -> ()
    %cst_10 = arith.constant dense<0.000000e+00> : vector<2x8x8xf32>
    %7 = tpu.matmul %4, %5, %cst_10 {dimension_numbers = #tpu.dot_dimension_numbers<[2], [2], [1], [1], [0, 0, 0, 1, 1, 1], [0], [0]>} : vector<2x8x16xf32>, vector<2x8x16xf32>, vector<2x8x8xf32> -> vector<2x8x8xf32>
    "tpu.trace_stop"() : () -> ()
    %cst_11 = arith.constant 0.176776692 : f32
    %8 = vector.broadcast %cst_11 : f32 to vector<2x8x8xf32>
    %9 = arith.mulf %7, %8 : vector<2x8x8xf32>
    %cst_12 = arith.constant dense<0xFF800000> : vector<2x8xf32>
    %10 = vector.multi_reduction <maximumf>, %9, %cst_12 [2] : vector<2x8x8xf32> to vector<2x8xf32>
    %11 = vector.shape_cast %10 : vector<2x8xf32> to vector<2x8x1xf32>
    %12 = vector.broadcast %11 : vector<2x8x1xf32> to vector<2x8x8xf32>
    %13 = arith.subf %9, %12 : vector<2x8x8xf32>
    %14 = math.exp %13 : vector<2x8x8xf32>
    %cst_13 = arith.constant dense<0.000000e+00> : vector<2x8xf32>
    %15 = vector.multi_reduction <add>, %14, %cst_13 [2] : vector<2x8x8xf32> to vector<2x8xf32>
    %16 = vector.shape_cast %15 : vector<2x8xf32> to vector<2x8x1xf32>
    %17 = vector.broadcast %16 : vector<2x8x1xf32> to vector<2x8x8xf32>
    %18 = arith.divf %14, %17 : vector<2x8x8xf32>
    "tpu.trace_start"() <{level = 10 : i32, message = "bqk,bkh->bqh"}> : () -> ()
    %cst_14 = arith.constant dense<0.000000e+00> : vector<2x8x16xf32>
    %19 = tpu.matmul %18, %6, %cst_14 {dimension_numbers = #tpu.dot_dimension_numbers<[2], [1], [1], [2], [0, 0, 0, 1, 1, 2], [0], [0]>} : vector<2x8x8xf32>, vector<2x8x16xf32>, vector<2x8x16xf32> -> vector<2x8x16xf32>
    "tpu.trace_stop"() : () -> ()
    %c0_15 = arith.constant 0 : index
    %c0_16 = arith.constant 0 : index
    %c0_17 = arith.constant 0 : index
    %20 = vector.load %arg5[%c0_15, %c0_16, %c0_17] : memref<2x8x16xf32, #tpu.memory_space<vmem>>, vector<2x8x16xf32>
    tpu.vector_store %arg5[%c0_15, %c0_16, %c0_17], %19 {strides = array<i32>} : memref<2x8x16xf32, #tpu.memory_space<vmem>>, vector<2x8x16xf32>,
    return
  }
  func.func @transform_0(%arg0: i32) -> (i32, i32, i32) {
    %c0_i32 = arith.constant 0 : i32
    %c0_i32_0 = arith.constant 0 : i32
    %c0_i32_1 = arith.constant 0 : i32
    return %arg0, %c0_i32, %c0_i32_0 : i32, i32, i32
  }
  func.func @transform_1(%arg0: i32) -> (i32, i32) {
    %c0_i32 = arith.constant 0 : i32
    %c0_i32_0 = arith.constant 0 : i32
    %c0_i32_1 = arith.constant 0 : i32
    return %c0_i32, %c0_i32_0 : i32, i32
  }
  func.func @transform_2(%arg0: i32) -> (i32, i32) {
    %c0_i32 = arith.constant 0 : i32
    %c0_i32_0 = arith.constant 0 : i32
    %c0_i32_1 = arith.constant 0 : i32
    return %c0_i32, %c0_i32_0 : i32, i32
  }
  func.func @transform_3(%arg0: i32) -> (i32, i32) {
    %c0_i32 = arith.constant 0 : i32
    %c0_i32_0 = arith.constant 0 : i32
    %c0_i32_1 = arith.constant 0 : i32
    return %c0_i32, %c0_i32_0 : i32, i32
  }
  func.func @transform_4(%arg0: i32) -> (i32, i32, i32) {
    %c0_i32 = arith.constant 0 : i32
    %c0_i32_0 = arith.constant 0 : i32
    %c0_i32_1 = arith.constant 0 : i32
    return %arg0, %c0_i32, %c0_i32_0 : i32, i32, i32
  }
}

</mosaic_0001>

<bundles_post_ra>
// kernel: tpu_custom_call.1
= control target key start
LH: loop header
LB: loop body
LE: loop exit
PB: predicated region body
PF: predicated region fallthrough
CT: control target
= control target key end

     0   :  { %vm32_vm0 = vcmask 261120   ;;  %s864_s0 = inlined_call_operand.vmem [shape: f32[2,8,32], index: 0, kind: input, shape index: {}]   ;;  %s865_s1 = inlined_call_operand.vmem [shape: f32[32,16], index: 1, kind: input, shape index: {}]   ;;  %s866_s2 = inlined_call_operand.vmem [shape: f32[32,16], index: 2, kind: input, shape index: {}]   ;;  %s867_s3 = inlined_call_operand.vmem [shape: f32[32,16], index: 3, kind: input, shape index: {}]   ;;  %s868_s4 = inlined_call_operand.hbm [shape: f32[2,8,16], index: 4, kind: output, shape index: {}]  }
   0x1   :  { %v20_v0 = vld [vmem:[%s865_s1] sm:$0xff]  ;;  %v21_v1 = vld [vmem:[%s865_s1 + $0x8] sm:$0xff]  ;;  %v22_v5 = vld [vmem:[%s865_s1 + $0x10] sm:$0xff] }
   0x2   :  { %v24_v2 = vld [vmem:[%s866_s2] sm:$0xff]  ;;  %v705_v3 = vpack.c.bf16 %v21_v1, %v20_v0  ;;  %v25_v4 = vld [vmem:[%s866_s2 + $0x8] sm:$0xff]  ;;  %v23_v6 = vld [vmem:[%s865_s1 + $0x18] sm:$0xff] }
   0x3   :  { %v697_v7 = vpack.c.bf16 %v25_v4, %v24_v2  ;;  %v709_v8 = vpack.c.bf16 %v23_v6, %v22_v5  ;;  %v26_v9 = vld [vmem:[%s866_s2 + $0x10] sm:$0xff]  ;;  %v27_v10 = vld [vmem:[%s866_s2 + $0x18] sm:$0xff]  ;;  %v18_v11 = vld [vmem:[%s864_s0] sm:$0xff] }
   0x4   :  { %706 = vmatprep.subr.bf16.mxu1 %v705_v3  ;;  %v701_v12 = vpack.c.bf16 %v27_v10, %v26_v9  ;;  %663 = vmatprep.mubr.msk.f32.mxu1 %vm32_vm0, %v18_v11 }
   0x5   :  { %9 = vsyncpa [#allocation3], 0  ;;  %708 = vmatpush3.bf16.msra.mxu1 %v705_v3  ;;  %698 = vmatprep.subr.bf16.mxu0 %v697_v7  ;;  %v19_v13 = vld [vmem:[%s864_s0 + $0x8] sm:$0xff]  ;;  %v758_v14 = vmov 0.0   ;;  %vm759_vm1 = vmmov 0   ;;  %vm264_vm2 = vcmask 130048  }
   0x6   :  { %700 = vmatpush3.bf16.msra.mxu0 %v697_v7  ;;  %710 = vmatprep.subr.bf16.mxu1 %v709_v8  ;;  %v28_v19 = vld [vmem:[%s867_s3] sm:$0xff]  ;;  %v29_v20 = vld [vmem:[%s867_s3 + $0x8] sm:$0xff]  ;;  %v30_v21 = vld [vmem:[%s867_s3 + $0x10] sm:$0xff]  ;;  %vm419_vm3 = vcmask 64512  }
   0x7   :  { %702 = vmatprep.subr.bf16.mxu0 %v701_v12  ;;  %652 = vmatprep.mubr.msk.f32.mxu0 %vm32_vm0, %v18_v11  ;;  %v713_v22 = vpack.c.bf16 %v29_v20, %v28_v19  ;;  %v31_v23 = vld [vmem:[%s867_s3 + $0x18] sm:$0xff]  ;;  %s760_s3 = smov [#allocation2]  }
   0x8   :  { %v717_v24 = vpack.c.bf16 %v31_v23, %v30_v21  ;;  %s595_s14 = sshll.u32 %s760_s3, 4  ;;  %s596_s14 = int_to_ptr.vmem [resolvable:$true] %s595_s14 }
   0x9   :  { %712 = vmatpush3.bf16.msra.mxu1 %v709_v8  ;;  %s734_s15 = scalar_lea.vmem %s596_s14, 256  ;;  %p739_p1 = scmp.lt.s32.totalorder %s596_s14, %s596_s14 }
   0xa   :  { %704 = vmatpush3.bf16.msra.mxu0 %v701_v12  ;;  %677 = vmatprep.subr.mxu1 %v758_v14  ;;  %p735_p0 = scmp.ne.s32.totalorder %s596_s14, %s734_s15  ;;  %p740_p2 = scmp.lt.s32.totalorder %s734_s15, %s734_s15 }
   0xb   :  { %714 = vmatprep.subr.bf16.mxu0 %v713_v22 }
   0xc   :  { %664 = vmatmul.mubr.msk.f32.vlgmr.msra.gmra.mrb[0].mxu1 %vm32_vm0, %v19_v13  ;;  %p741_p3 = por %p740_p2, %p739_p1 }
   0xd   :  { %653 = vmatmul.mubr.msk.f32.vlgmr.msra.gmra.mrb[0].mxu0 %vm32_vm0, %v19_v13  ;;  %679 = vmatprep.mubr.msk.f32.mxu1 %vm759_vm1, %v758_v14 }
   0xe   :  { %674 = vmatprep.mubr.msk.f32.mxu0 %vm32_vm0, %v18_v11  ;;  %716 = vmatpush3.bf16.msra.mxu0 %v713_v22  ;;  %p742_p4 = pnand %p741_p3, %p735_p0 }
   0xf   :  { %718 = vmatprep.subr.bf16.mxu0 %v717_v24 }
  0x12   :  { %720 = vmatpush3.bf16.msra.mxu0 %v717_v24 }
  0x13   :  { %687 = vmatprep.subr.mxu0 %v758_v14 }
  0x15   :  { %675 = vmatmul.mubr.msk.f32.vlgmr.msra.gmra.mrb[2].mxu0 %vm32_vm0, %v19_v13 }
  0x16   :  { %689 = vmatprep.mubr.msk.f32.mxu0 %vm759_vm1, %v758_v14 }
  0xdf   :  { %v665_v15 = vpop.f32.mrb[0].mxu1 }
  0xe0   :  { %v180_v16 = vpop.f32.mrb[1].mxu1  ;;  %v654_v17 = vpop.f32.mrb[0].mxu0 }
  0xe1   :  { %678 = vmatpush3.xpose.msk.msra.mxu1 %vm264_vm2, %v180_v16  ;;  %v105_v18 = vpop.f32.mrb[1].mxu0 }
  0xe2   :  { %682 = vmatprep.subr.mxu1 %v758_v14 }
  0xe4   :  { %680 = vmatmul.mubr.msk.f32.vlgmr.msra.gmra.mrb[2].mxu1 %vm264_vm2, %v105_v18 }
  0xe5   :  { %683 = vmatpush3.xpose.msk.msra.mxu1 %vm264_vm2, %v665_v15  ;;  %684 = vmatprep.mubr.msk.f32.mxu1 %vm759_vm1, %v758_v14 }
  0xe6   :  { %692 = vmatprep.subr.mxu1 %v758_v14 }
  0xe8   :  { %685 = vmatmul.mubr.msk.f32.vlgmr.msra.gmra.mrb[4].mxu1 %vm264_vm2, %v654_v17  ;;  %v676_v43 = vpop.f32.mrb[2].mxu0 }
  0xe9   :  { %694 = vmatprep.mubr.msk.f32.mxu1 %vm759_vm1, %v758_v14  ;;  %v255_v44 = vpop.f32.mrb[3].mxu0  ;;  %693 = vmatpush3.msra.mxu1 %v676_v43 }
  0xea   :  { %688 = vmatpush3.msra.mxu0 %v255_v44 }
 0x1b7   :  { %v337_v25 = vpop.f32.mrb[2].mxu1 }
 0x1b8   :  { %v417_v26 = vmul.f32 0.17677669, %v337_v25  ;;  %v681_v27 = vpop.f32.mrb[3].mxu1 }
 0x1ba   :  { %v420_v28 = vsel %vm419_vm3, %v417_v26, -inf }
 0x1bb   :  { %421 = vmax.xlane.f32.xlu0 %v420_v28  ;;  %v413_v29 = vpop.f32.mrb[4].mxu1 }
 0x1bc   :  { %v418_v30 = vmul.f32 0.17677669, %v413_v29  ;;  %v686_v31 = vpop.f32.mrb[5].mxu1 }
 0x1be   :  { %v423_v32 = vsel %vm419_vm3, %v418_v30, -inf }
 0x1bf   :  { %424 = vmax.xlane.f32.xlu0 %v423_v32 }
 0x248   :  { %v422_v33 = vpop.xlane.xlu0 %421 }
 0x249   :  { %v426_v34 = vsub.f32 %v417_v26, %v422_v33 }
 0x24b   :  { %v428_v35 = vmul.f32 1.442695, %v426_v34 }
 0x24c   :  { %v425_v36 = vpop.xlane.xlu0 %424 }
 0x24d   :  { %726 = vpow2.f32 %v428_v35  ;;  %v427_v37 = vsub.f32 %v418_v30, %v425_v36 }
 0x24f   :  { %v430_v38 = vmul.f32 1.442695, %v427_v37 }
 0x251   :  { %728 = vpow2.f32 %v430_v38 }
 0x257   :  { %v727_v39 = vpop.eup %726 }
 0x258   :  { %v432_v40 = vsel %vm419_vm3, %v727_v39, 0.0 }
 0x259   :  { %433 = vadd.xlane.f32.xlu1 %v432_v40 }
 0x25b   :  { %v729_v41 = vpop.eup %728 }
 0x25c   :  { %v435_v42 = vsel %vm419_vm3, %v729_v41, 0.0 }
 0x25d   :  { %436 = vadd.xlane.f32.xlu1 %v435_v42 }
 0x2e6   :  { %v434_v45 = vpop.xlane.xlu1 %433 }
 0x2e7   :  { %730 = vrcp.f32 %v434_v45 }
 0x2ea   :  { %v437_v46 = vpop.xlane.xlu1 %436 }
 0x2eb   :  { %732 = vrcp.f32 %v437_v46 }
 0x2f1   :  { %v731_v47 = vpop.eup %730 }
 0x2f2   :  { %v439_v48 = vmul.f32 %v731_v47, %v727_v39 }
 0x2f4   :  { %690 = vmatmul.mubr.msk.f32.vlgmr.msra.gmra.mrb[4].mxu0 %vm419_vm3, %v439_v48 }
 0x2f5   :  { %v733_v49 = vpop.eup %732 }
 0x2f6   :  { %v441_v50 = vmul.f32 %v733_v49, %v729_v41 }
 0x2f8   :  { %695 = vmatmul.mubr.msk.f32.vlgmr.msra.gmra.mrb[6].mxu1 %vm419_vm3, %v441_v50 }
 0x3c7   :  { %v511_v51 = vpop.f32.mrb[4].mxu0 }
 0x3c8   :  { %588 = vst.msk [vmem:[#allocation2] sm:$0xff] %vm264_vm2, %v511_v51  ;;  %v691_v52 = vpop.f32.mrb[5].mxu0 }
 0x3cb   :  { %v584_v53 = vpop.f32.mrb[6].mxu1 }
 0x3cc   :  { %589 = vst.msk [vmem:[#allocation2 + $0x8] sm:$0xff] %vm264_vm2, %v584_v53  ;;  %v696_v54 = vpop.f32.mrb[7].mxu1 }
 0x3cd   :  { %745 = shalt.err (!%p742_p4)
}
 0x3ce   :  { %s746_s18 = scalar_lea.hbm %s868_s4, 256 }
 0x3cf   :  { %p747_p5 = scmp.ne.s32.totalorder %s868_s4, %s746_s18  ;;  %p750_p6 = scmp.lt.u32.totalorder %s746_s18, %s868_s4 }
 0x3d1   :  { %p752_p7 = pnand %p750_p6, %p747_p5 }
 0x3d3   :  { %755 = shalt.err (!%p752_p7)
}
 0x3d4   :  { %s761_s23 = smov 128   ;;  %s762_s24 = smov 8  }
 0x3d5   :  { %601 = dma.vmem_to_hbm [thread:$0]  %s596_s14, 256, %s868_s4, [#allocation3], %s761_s23, %s761_s23, %s762_s24  }
 0x3d6   :  { %756 = dma.done.wait [#allocation3], 256  }
 0x3d7   :  { %757 = vsyncadd [#allocation3], 4294967040 }
 0x3d8   :  { %605 = vsyncpa [#allocation3], 1 }

</bundles_post_ra>
